<compile_context>
chip_gen: v6e
topology: v6e:2x2x1
jax: 0.10.0
libtpu: 0.0.40
codegen_flags: <defaults>
</compile_context>

<pallas_src>
import functools

import jax
import jax.numpy as jnp
from jax import lax
from jax.experimental import pallas as pl
from jax.experimental.pallas import tpu as pltpu

LANE = 128                        # lane width (last-dim granularity)
_ROW_TILE = 512                   # TM for large graphs
_K_TILE = 512                     # TK for large graphs
_XW_RESIDENT_BYTES = 8 << 20      # keep XW resident if <= 8 MiB (safe on v7x 64 MiB)
_VMEM_CAP = 48 << 20              # never ask for more scoped VMEM than this


def _round_up(x, m):
    return -(-x // m) * m


def _choose_padding_and_tiles(n):
    """Pad N and pick (TM, TK) so both divide N_pad and satisfy (8,128) tiling."""
    n_pad = _round_up(n, LANE)
    if n_pad <= _K_TILE:
        # Small graph: single reduction tile, but >=2 row tiles so the leading
        # "parallel" axis can shard across both v7x TensorCores.
        tm = n_pad // 2          # n_pad is a multiple of 128 -> tm multiple of 64
        return n_pad, tm, n_pad
    n_pad = _round_up(n, max(_ROW_TILE, _K_TILE))
    return n_pad, _ROW_TILE, _K_TILE


def _vmem_limit(buf_bytes):
    """Scoped-VMEM limit from tile footprint (x2 for double-buffering) + margin."""
    total = 2 * sum(buf_bytes) + (2 << 20)
    return int(min(max(total, 16 << 20), _VMEM_CAP))


# --------------------------------------------------------------------------
# Kernel 1: per-layer feature transform  XW = X @ W_l   (tiny, row-tiled)
# --------------------------------------------------------------------------
def _xw_kernel(x_ref, w_ref, o_ref):
    o_ref[...] = jnp.dot(x_ref[...], w_ref[...],
                         preferred_element_type=jnp.float32).astype(o_ref.dtype)


def xw_matmul(x_pad, W_pad, *, tm):
    n_pad, fin_pad = x_pad.shape
    h_pad = W_pad.shape[1]
    grid = (n_pad // tm,)
    bufs = (tm * fin_pad * 2, fin_pad * h_pad * 2, tm * h_pad * 2)
    cost = pl.CostEstimate(
        flops=2 * n_pad * fin_pad * h_pad,
        transcendentals=0,
        bytes_accessed=n_pad * fin_pad * 2 + fin_pad * h_pad * 2 + n_pad * h_pad * 2,
    )
    return pl.pallas_call(
        _xw_kernel,
        out_shape=jax.ShapeDtypeStruct((n_pad, h_pad), jnp.bfloat16),
        grid=grid,
        in_specs=[
            pl.BlockSpec((tm, fin_pad), lambda i: (i, 0)),
            pl.BlockSpec((fin_pad, h_pad), lambda i: (0, 0)),   # W resident
        ],
        out_specs=pl.BlockSpec((tm, h_pad), lambda i: (i, 0)),
        compiler_params=pltpu.CompilerParams(
            dimension_semantics=("parallel",),
            vmem_limit_bytes=_vmem_limit(bufs),
        ),
        cost_estimate=cost,
    )(x_pad, W_pad)


# --------------------------------------------------------------------------
# Kernel 2: propagation + bias + relu       h = relu(S @ XW + b)
#   (intermediate SGConv layers)
# --------------------------------------------------------------------------
def _prop_relu_kernel(tk, s_ref, xw_ref, b_ref, o_ref, acc_ref):
    k = pl.program_id(1)

    @pl.when(k == 0)
    def _init():
        acc_ref[...] = jnp.zeros_like(acc_ref)

    if xw_ref.shape[0] == tk:                 # tiled XW: block is exactly (tk, h_pad)
        xw = xw_ref[...]
    else:                                     # VMEM-resident XW: slice the k chunk
        off = pl.multiple_of(k * tk, tk)
        xw = xw_ref[pl.ds(off, tk), :]

    acc_ref[...] += jnp.dot(s_ref[...], xw, preferred_element_type=jnp.float32)

    @pl.when(k == pl.num_programs(1) - 1)
    def _finalize():
        o_ref[...] = jnp.maximum(acc_ref[...] + b_ref[...], 0.0).astype(o_ref.dtype)


def prop_relu(S_pad, XW, b_pad, *, tm, tk, resident):
    n_pad = S_pad.shape[0]
    h_pad = XW.shape[1]
    grid = (n_pad // tm, n_pad // tk)

    if resident:
        xw_spec = pl.BlockSpec((n_pad, h_pad), lambda i, k: (0, 0))   # fetched once
        xw_bytes = n_pad * h_pad * 2
        xw_traffic = n_pad * h_pad * 2
    else:
        xw_spec = pl.BlockSpec((tk, h_pad), lambda i, k: (k, 0))
        xw_bytes = tk * h_pad * 2
        xw_traffic = grid[0] * n_pad * h_pad * 2   # re-read once per row tile

    bufs = (tm * tk * 2, xw_bytes, h_pad * 4, tm * h_pad * 2, tm * h_pad * 4)
    cost = pl.CostEstimate(
        flops=2 * n_pad * n_pad * h_pad,
        transcendentals=0,
        bytes_accessed=n_pad * n_pad * 2 + xw_traffic + n_pad * h_pad * 2,
    )

    return pl.pallas_call(
        functools.partial(_prop_relu_kernel, tk),
        out_shape=jax.ShapeDtypeStruct((n_pad, h_pad), jnp.bfloat16),
        grid=grid,
        in_specs=[
            pl.BlockSpec((tm, tk), lambda i, k: (i, k)),     # S tile (dominant stream)
            xw_spec,                                         # XW tile / resident
            pl.BlockSpec((1, h_pad), lambda i, k: (0, 0)),   # bias
        ],
        out_specs=pl.BlockSpec((tm, h_pad), lambda i, k: (i, 0)),
        scratch_shapes=[pltpu.VMEM((tm, h_pad), jnp.float32)],
        compiler_params=pltpu.CompilerParams(
            dimension_semantics=("parallel", "arbitrary"),
            vmem_limit_bytes=_vmem_limit(bufs),
        ),
        cost_estimate=cost,
    )(S_pad, XW, b_pad)


# --------------------------------------------------------------------------
# Kernel 3: last layer fused with the final linear (res=True concat folded in
#           as per-layer weight slabs) and log_softmax.
#   out = log_softmax( concat(h_0..h_{L-1}) @ W_lin + b_lin )
#   with h_{L-1} = relu(S @ XW_last + b_last) produced in the finalize.
# --------------------------------------------------------------------------
def _prop_relu_lin_logsm_kernel(tk, nlayer, h_pad, nclass, *refs):
    s_ref, xw_ref, b_ref = refs[0], refs[1], refs[2]
    h_prev_refs = refs[3:3 + (nlayer - 1)]
    w_lin_ref = refs[3 + (nlayer - 1)]
    b_lin_ref = refs[4 + (nlayer - 1)]
    o_ref = refs[5 + (nlayer - 1)]
    acc_ref = refs[6 + (nlayer - 1)]

    k = pl.program_id(1)

    @pl.when(k == 0)
    def _init():
        acc_ref[...] = jnp.zeros_like(acc_ref)

    if xw_ref.shape[0] == tk:
        xw = xw_ref[...]
    else:
        off = pl.multiple_of(k * tk, tk)
        xw = xw_ref[pl.ds(off, tk), :]

    acc_ref[...] += jnp.dot(s_ref[...], xw, preferred_element_type=jnp.float32)

    @pl.when(k == pl.num_programs(1) - 1)
    def _finalize():
        # Last hidden layer (bias + relu), f32 accumulator -> bf16 for the MXU.
        h_last = jnp.maximum(acc_ref[...] + b_ref[...], 0.0).astype(jnp.bfloat16)

        # Implicit concat: sum of per-layer slab matmuls (static slab slices).
        logits = jnp.dot(h_last,
                         w_lin_ref[(nlayer - 1) * h_pad:nlayer * h_pad, :],
                         preferred_element_type=jnp.float32)
        for l in range(nlayer - 1):
            logits = logits + jnp.dot(
                h_prev_refs[l][...],
                w_lin_ref[l * h_pad:(l + 1) * h_pad, :],
                preferred_element_type=jnp.float32)
        logits = logits + b_lin_ref[...]

        # Mask padded class lanes so they do not pollute the softmax.
        col = lax.broadcasted_iota(jnp.int32, logits.shape, 1)
        logits = jnp.where(col < nclass, logits, jnp.float32(-1e30))

        m = jnp.max(logits, axis=-1, keepdims=True)
        z = logits - m
        lse = jnp.log(jnp.sum(jnp.exp(z), axis=-1, keepdims=True))
        o_ref[...] = (z - lse).astype(o_ref.dtype)


def prop_relu_lin_logsoftmax(S_pad, XW, b_pad, hs_prev, W_lin_pad, b_lin_pad,
                             nclass, *, tm, tk, resident):
    n_pad = S_pad.shape[0]
    h_pad = XW.shape[1]
    c_pad = W_lin_pad.shape[1]
    nlayer = len(hs_prev) + 1
    grid = (n_pad // tm, n_pad // tk)

    if resident:
        xw_spec = pl.BlockSpec((n_pad, h_pad), lambda i, k: (0, 0))
        xw_bytes = n_pad * h_pad * 2
        xw_traffic = n_pad * h_pad * 2
    else:
        xw_spec = pl.BlockSpec((tk, h_pad), lambda i, k: (k, 0))
        xw_bytes = tk * h_pad * 2
        xw_traffic = grid[0] * n_pad * h_pad * 2

    # Previous-layer h tiles: index does not depend on k -> DMA'd once per row tile.
    in_specs = (
        [pl.BlockSpec((tm, tk), lambda i, k: (i, k)),
         xw_spec,
         pl.BlockSpec((1, h_pad), lambda i, k: (0, 0))]
        + [pl.BlockSpec((tm, h_pad), lambda i, k: (i, 0)) for _ in hs_prev]
        + [pl.BlockSpec((nlayer * h_pad, c_pad), lambda i, k: (0, 0)),   # W_lin resident
           pl.BlockSpec((1, c_pad), lambda i, k: (0, 0))]
    )

    bufs = (tm * tk * 2, xw_bytes, h_pad * 4,
            (nlayer - 1) * tm * h_pad * 2,
            nlayer * h_pad * c_pad * 2, c_pad * 4,
            tm * c_pad * 4, tm * h_pad * 4)
    cost = pl.CostEstimate(
        flops=2 * n_pad * n_pad * h_pad + 2 * n_pad * nlayer * h_pad * c_pad,
        transcendentals=n_pad * c_pad,
        bytes_accessed=(n_pad * n_pad * 2 + xw_traffic
                        + (nlayer - 1) * n_pad * h_pad * 2
                        + nlayer * h_pad * c_pad * 2
                        + n_pad * c_pad * 4),
    )

    kernel = functools.partial(_prop_relu_lin_logsm_kernel, tk, nlayer, h_pad, nclass)

    return pl.pallas_call(
        kernel,
        out_shape=jax.ShapeDtypeStruct((n_pad, c_pad), jnp.float32),
        grid=grid,
        in_specs=in_specs,
        out_specs=pl.BlockSpec((tm, c_pad), lambda i, k: (i, 0)),
        scratch_shapes=[pltpu.VMEM((tm, h_pad), jnp.float32)],
        compiler_params=pltpu.CompilerParams(
            dimension_semantics=("parallel", "arbitrary"),
            vmem_limit_bytes=_vmem_limit(bufs),
        ),
        cost_estimate=cost,
    )(S_pad, XW, b_pad, *hs_prev, W_lin_pad, b_lin_pad)


# --------------------------------------------------------------------------
# Glue: normalized adjacency + parameter init + model wrapper
# --------------------------------------------------------------------------
def gcn_norm_dense(edge_index, num_nodes, edge_weight=None):
    """Dense D^{-1/2} (A + I) D^{-1/2} with A[dst, src] = edge weight."""
    src, dst = edge_index[0], edge_index[1]
    if edge_weight is None:
        edge_weight = jnp.ones(src.shape[0], dtype=jnp.float32)
    A = jnp.zeros((num_nodes, num_nodes), jnp.float32)
    A = A.at[dst, src].add(edge_weight)
    A = A + jnp.eye(num_nodes, dtype=jnp.float32)  # add_self_loops
    deg = A.sum(axis=1)
    dinv = jnp.where(deg > 0, 1.0 / jnp.sqrt(deg), 0.0)
    return dinv[:, None] * A * dinv[None, :]


def init_sgc_params(key, nfeat, nhid, nclass, nlayer):
    params = {"convs": []}
    nlast = nfeat
    for _ in range(nlayer):
        key, kw, kb = jax.random.split(key, 3)
        bound = 1.0 / jnp.sqrt(nlast)
        W = jax.random.uniform(kw, (nlast, nhid), jnp.float32, -bound, bound)
        b = jax.random.uniform(kb, (nhid,), jnp.float32, -bound, bound)
        params["convs"].append((W, b))
        nlast = nhid
    key, kw, kb = jax.random.split(key, 3)
    nin = nhid * nlayer  # res=True
    bound = 1.0 / jnp.sqrt(nin)
    params["lin_W"] = jax.random.uniform(kw, (nin, nclass), jnp.float32, -bound, bound)
    params["lin_b"] = jax.random.uniform(kb, (nclass,), jnp.float32, -bound, bound)
    return params


@functools.partial(jax.jit, static_argnames=("num_nodes",))
def sgc_forward(params, x, edge_index, edge_weight, num_nodes):
    # TODO(synk): dropout is identity here (module in eval mode / training=False).
    # TODO(synk): for very large graphs a sparse CSR + scalar-prefetch gather path
    #             should replace the dense O(N^2) S built here.
    # TODO(synk): S could be quantized (fp8 on v7x, int8 on v5e/v6e) with a per-row
    #             scale folded into dinv to halve the dominant HBM stream.
    N = num_nodes
    nfeat = x.shape[1]
    convs = params["convs"]
    nlayer = len(convs)
    nhid = convs[0][0].shape[1]
    nclass = params["lin_W"].shape[1]

    n_pad, tm, tk = _choose_padding_and_tiles(N)
    f0_pad = _round_up(nfeat, LANE)
    h_pad = _round_up(nhid, LANE)
    c_pad = _round_up(nclass, LANE)

    # Keep the propagated operand (XW) fully VMEM-resident when it is small.
    # TODO(synk): this threshold could be raised to ~16-24 MiB on 128 MiB-VMEM
    #             parts (v5e/v6e); kept conservative so it also fits v7x (64 MiB).
    resident = (n_pad * h_pad * 2) <= _XW_RESIDENT_BYTES

    # Normalized adjacency, written straight into a padded bf16 buffer
    # (no extra O(N^2) f32 materialization + cast pass).
    S = gcn_norm_dense(edge_index, N, edge_weight)
    S_pad = jnp.zeros((n_pad, n_pad), jnp.bfloat16).at[:N, :N].set(
        S.astype(jnp.bfloat16))

    # NOTE: padded node rows (>= N) end up with relu(b_l) != 0 in the hidden
    # activations.  They cannot pollute real rows because the padded *columns*
    # of S are zero, and they are sliced off at the end.
    h = jnp.zeros((n_pad, f0_pad), jnp.bfloat16).at[:N, :nfeat].set(
        x.astype(jnp.bfloat16))

    # Final linear weights: res=True concat folded in as per-layer slabs.
    W_lin = params["lin_W"]
    W_lin_p = jnp.zeros((nlayer * h_pad, c_pad), jnp.float32)
    for l in range(nlayer):
        W_lin_p = W_lin_p.at[l * h_pad:l * h_pad + nhid, :nclass].set(
            W_lin[l * nhid:(l + 1) * nhid, :])
    W_lin_p = W_lin_p.astype(jnp.bfloat16)
    b_lin_p = jnp.zeros((1, c_pad), jnp.float32).at[0, :nclass].set(params["lin_b"])

    hs_prev = []
    fin_pad = f0_pad
    out_pad = None
    for l, (W, b) in enumerate(convs):
        fin = W.shape[0]
        W_p = (jnp.zeros((fin_pad, h_pad), jnp.float32)
               .at[:fin, :nhid].set(W)).astype(jnp.bfloat16)
        b_p = jnp.zeros((1, h_pad), jnp.float32).at[0, :nhid].set(b)

        # Reassociated layer math: relu(S @ (X @ W) + b).
        xw = xw_matmul(h, W_p, tm=tm)

        if l < nlayer - 1:
            h = prop_relu(S_pad, xw, b_p, tm=tm, tk=tk, resident=resident)
            hs_prev.append(h)
            fin_pad = h_pad
        else:
            # Last layer fused with final linear (over implicit concat) + log_softmax.
            out_pad = prop_relu_lin_logsoftmax(
                S_pad, xw, b_p, hs_prev, W_lin_p, b_lin_p, nclass,
                tm=tm, tk=tk, resident=resident)

    return out_pad[:N, :nclass]


# --------------------------------------------------------------------------
# Pure-JAX reference (f32) for validation
# --------------------------------------------------------------------------
def sgc_reference(params, x, S):
    h = x
    hs = []
    for (W, b) in params["convs"]:
        h = jnp.maximum(S @ (h @ W) + b, 0.0)
        hs.append(h)
    z = jnp.concatenate(hs, axis=-1) @ params["lin_W"] + params["lin_b"]
    m = jnp.max(z, axis=-1, keepdims=True)
    zc = z - m
    return zc - jnp.log(jnp.sum(jnp.exp(zc), axis=-1, keepdims=True))


# --------------------------------------------------------------------------
# Demo
# --------------------------------------------------------------------------
if __name__ == "__main__":
    N, nfeat, nhid, nclass, nlayer = 16, 8, 32, 4, 2

    key = jax.random.PRNGKey(0)
    key, kx = jax.random.split(key)

    x = jax.random.normal(kx, (N, nfeat), dtype=jnp.float32)

    # Small deterministic symmetric ring graph.
    src = jnp.arange(N, dtype=jnp.int32)
    dst = (src + 1) % N
    edge_index = jnp.stack(
        [jnp.concatenate([src, dst]), jnp.concatenate([dst, src])], axis=0
    )
    edge_weight = None

    params = init_sgc_params(key, nfeat, nhid, nclass, nlayer)

    out = sgc_forward(params, x, edge_index, edge_weight, N)
    out = jax.block_until_ready(out)

    assert out.shape == (N, nclass)
    # log_softmax rows should sum (in prob space) to ~1
    assert jnp.allclose(jnp.exp(out).sum(axis=1), 1.0, atol=1e-4)

    # Compare against the pure-JAX f32 reference (bf16 streams -> loose tolerance).
    S_ref = gcn_norm_dense(edge_index, N, edge_weight)
    ref = sgc_reference(params, x, S_ref)
    max_err = float(jnp.max(jnp.abs(out - ref)))
    assert max_err < 0.2, f"max |log-prob diff| vs reference too large: {max_err}"

    print("KERNEL_OK")
</pallas_src>

<mosaic_0001>
module attributes {stable_mosaic.version = 11 : i64} {
  func.func private @main(%arg0: i32) attributes {dimension_semantics = [#tpu.dimension_semantics<core_parallel>], iteration_bounds = array<i64: 2>, tpu.core_type = #tpu.core_type<sc_scalar_subcore>, window_params = []} {
    return
  }
}

module attributes {stable_mosaic.version = 11 : i64} {
  func.func private @main(%arg0: i32) attributes {dimension_semantics = [#tpu.dimension_semantics<core_parallel>], iteration_bounds = array<i64: 2>, tpu.core_type = #tpu.core_type<sc_scalar_subcore>, window_params = []} {
    return
  }
}

module attributes {stable_mosaic.version = 11 : i64} {
  func.func @_xw_kernel(%arg0: i32, %arg1: memref<64x128xbf16, #tpu.memory_space<vmem>>, %arg2: memref<128x128xbf16, #tpu.memory_space<vmem>>, %arg3: memref<64x128xbf16, #tpu.memory_space<vmem>>) attributes {dimension_semantics = [#tpu.dimension_semantics<parallel>], iteration_bounds = array<i64: 2>, scalar_prefetch = 0 : i64, scratch_operands = 0 : i64, tpu.core_type = #tpu.core_type<tc>, window_params = [{transform_indices = @transform_0, window_bounds = array<i64: 64, 128>}, {pipeline_mode = #tpu.pipeline_mode<synchronous>, transform_indices = @transform_1, window_bounds = array<i64: 128, 128>}, {transform_indices = @transform_2, window_bounds = array<i64: 64, 128>}]} {
    %c0 = arith.constant 0 : index
    %c0_0 = arith.constant 0 : index
    %0 = vector.load %arg1[%c0, %c0_0] : memref<64x128xbf16, #tpu.memory_space<vmem>>, vector<64x128xbf16>
    %c0_1 = arith.constant 0 : index
    %c0_2 = arith.constant 0 : index
    %1 = vector.load %arg2[%c0_1, %c0_2] : memref<128x128xbf16, #tpu.memory_space<vmem>>, vector<128x128xbf16>
    %cst = arith.constant dense<0.000000e+00> : vector<64x128xf32>
    %2 = tpu.matmul %0, %1, %cst {dimension_numbers = #tpu.dot_dimension_numbers<[1], [0], [0], [1], [0, 0, 1, 1], [], []>} : vector<64x128xbf16>, vector<128x128xbf16>, vector<64x128xf32> -> vector<64x128xf32>
    %3 = arith.truncf %2 : vector<64x128xf32> to vector<64x128xbf16>
    %c0_3 = arith.constant 0 : index
    %c0_4 = arith.constant 0 : index
    %4 = vector.load %arg3[%c0_3, %c0_4] : memref<64x128xbf16, #tpu.memory_space<vmem>>, vector<64x128xbf16>
    tpu.vector_store %arg3[%c0_3, %c0_4], %3 {strides = array<i32>} : memref<64x128xbf16, #tpu.memory_space<vmem>>, vector<64x128xbf16>,
    return
  }
  func.func @transform_0(%arg0: i32) -> (i32, i32) {
    %c0_i32 = arith.constant 0 : i32
    %c0_i32_0 = arith.constant 0 : i32
    return %arg0, %c0_i32 : i32, i32
  }
  func.func @transform_1(%arg0: i32) -> (i32, i32) {
    %c0_i32 = arith.constant 0 : i32
    %c0_i32_0 = arith.constant 0 : i32
    %c0_i32_1 = arith.constant 0 : i32
    return %c0_i32, %c0_i32_0 : i32, i32
  }
  func.func @transform_2(%arg0: i32) -> (i32, i32) {
    %c0_i32 = arith.constant 0 : i32
    %c0_i32_0 = arith.constant 0 : i32
    return %arg0, %c0_i32 : i32, i32
  }
}

module attributes {stable_mosaic.version = 11 : i64} {
  func.func @_prop_relu_kernel(%arg0: i32, %arg1: i32, %arg2: memref<64x128xbf16, #tpu.memory_space<vmem>>, %arg3: memref<128x128xbf16, #tpu.memory_space<vmem>>, %arg4: memref<1x128xf32, #tpu.memory_space<vmem>>, %arg5: memref<64x128xbf16, #tpu.memory_space<vmem>>, %arg6: memref<64x128xf32, #tpu.memory_space<vmem>>) attributes {dimension_semantics = [#tpu.dimension_semantics<parallel>, #tpu.dimension_semantics<arbitrary>], iteration_bounds = array<i64: 2, 1>, scalar_prefetch = 0 : i64, scratch_operands = 1 : i64, tpu.core_type = #tpu.core_type<tc>, window_params = [{transform_indices = @transform_0, window_bounds = array<i64: 64, 128>}, {pipeline_mode = #tpu.pipeline_mode<synchronous>, transform_indices = @transform_1, window_bounds = array<i64: 128, 128>}, {pipeline_mode = #tpu.pipeline_mode<synchronous>, transform_indices = @transform_2, window_bounds = array<i64: 1, 128>}, {transform_indices = @transform_3, window_bounds = array<i64: 64, 128>}]} {
    %c0_i32 = arith.constant 0 : i32
    %0 = arith.cmpi eq, %arg1, %c0_i32 : i32
    %1 = arith.extui %0 : i1 to i32
    %c0_i32_0 = arith.constant 0 : i32
    %2 = arith.cmpi ne, %1, %c0_i32_0 : i32
    scf.if %2 {
      %cst_10 = arith.constant 0.000000e+00 : f32
      %12 = vector.broadcast %cst_10 : f32 to vector<64x128xf32>
      %c0_11 = arith.constant 0 : index
      %c0_12 = arith.constant 0 : index
      %13 = vector.load %arg6[%c0_11, %c0_12] : memref<64x128xf32, #tpu.memory_space<vmem>>, vector<64x128xf32>
      tpu.vector_store %arg6[%c0_11, %c0_12], %12 {strides = array<i32>} : memref<64x128xf32, #tpu.memory_space<vmem>>, vector<64x128xf32>,
    } else {
    }
    %c0 = arith.constant 0 : index
    %c0_1 = arith.constant 0 : index
    %3 = vector.load %arg3[%c0, %c0_1] : memref<128x128xbf16, #tpu.memory_space<vmem>>, vector<128x128xbf16>
    %c0_2 = arith.constant 0 : index
    %c0_3 = arith.constant 0 : index
    %4 = vector.load %arg6[%c0_2, %c0_3] : memref<64x128xf32, #tpu.memory_space<vmem>>, vector<64x128xf32>
    %c0_4 = arith.constant 0 : index
    %c0_5 = arith.constant 0 : index
    %5 = vector.load %arg2[%c0_4, %c0_5] : memref<64x128xbf16, #tpu.memory_space<vmem>>, vector<64x128xbf16>
    %cst = arith.constant dense<0.000000e+00> : vector<64x128xf32>
    %6 = tpu.matmul %5, %3, %cst {dimension_numbers = #tpu.dot_dimension_numbers<[1], [0], [0], [1], [0, 0, 1, 1], [], []>} : vector<64x128xbf16>, vector<128x128xbf16>, vector<64x128xf32> -> vector<64x128xf32>
    %7 = arith.addf %4, %6 : vector<64x128xf32>
    %c0_6 = arith.constant 0 : index
    %c0_7 = arith.constant 0 : index
    %8 = vector.load %arg6[%c0_6, %c0_7] : memref<64x128xf32, #tpu.memory_space<vmem>>, vector<64x128xf32>
    tpu.vector_store %arg6[%c0_6, %c0_7], %7 {strides = array<i32>} : memref<64x128xf32, #tpu.memory_space<vmem>>, vector<64x128xf32>,
    %c0_i32_8 = arith.constant 0 : i32
    %9 = arith.cmpi eq, %arg1, %c0_i32_8 : i32
    %10 = arith.extui %9 : i1 to i32
    %c0_i32_9 = arith.constant 0 : i32
    %11 = arith.cmpi ne, %10, %c0_i32_9 : i32
    scf.if %11 {
      %c0_10 = arith.constant 0 : index
      %c0_11 = arith.constant 0 : index
      %12 = vector.load %arg6[%c0_10, %c0_11] : memref<64x128xf32, #tpu.memory_space<vmem>>, vector<64x128xf32>
      %c0_12 = arith.constant 0 : index
      %c0_13 = arith.constant 0 : index
      %13 = vector.load %arg4[%c0_12, %c0_13] : memref<1x128xf32, #tpu.memory_space<vmem>>, vector<1x128xf32>
      %14 = vector.broadcast %13 : vector<1x128xf32> to vector<64x128xf32>
      %15 = arith.addf %12, %14 : vector<64x128xf32>
      %cst_14 = arith.constant 0.000000e+00 : f32
      %16 = vector.broadcast %cst_14 : f32 to vector<64x128xf32>
      %17 = arith.maximumf %15, %16 : vector<64x128xf32>
      %18 = arith.truncf %17 : vector<64x128xf32> to vector<64x128xbf16>
      %c0_15 = arith.constant 0 : index
      %c0_16 = arith.constant 0 : index
      %19 = vector.load %arg5[%c0_15, %c0_16] : memref<64x128xbf16, #tpu.memory_space<vmem>>, vector<64x128xbf16>
      tpu.vector_store %arg5[%c0_15, %c0_16], %18 {strides = array<i32>} : memref<64x128xbf16, #tpu.memory_space<vmem>>, vector<64x128xbf16>,
    } else {
    }
    return
  }
  func.func @transform_0(%arg0: i32, %arg1: i32) -> (i32, i32) {
    %c0_i32 = arith.constant 0 : i32
    return %arg0, %arg1 : i32, i32
  }
  func.func @transform_1(%arg0: i32, %arg1: i32) -> (i32, i32) {
    %c0_i32 = arith.constant 0 : i32
    %c0_i32_0 = arith.constant 0 : i32
    %c0_i32_1 = arith.constant 0 : i32
    return %c0_i32, %c0_i32_0 : i32, i32
  }
  func.func @transform_2(%arg0: i32, %arg1: i32) -> (i32, i32) {
    %c0_i32 = arith.constant 0 : i32
    %c0_i32_0 = arith.constant 0 : i32
    %c0_i32_1 = arith.constant 0 : i32
    return %c0_i32, %c0_i32_0 : i32, i32
  }
  func.func @transform_3(%arg0: i32, %arg1: i32) -> (i32, i32) {
    %c0_i32 = arith.constant 0 : i32
    %c0_i32_0 = arith.constant 0 : i32
    return %arg0, %c0_i32 : i32, i32
  }
}

module attributes {stable_mosaic.version = 11 : i64} {
  func.func @_prop_relu_lin_logsm_kernel(%arg0: i32, %arg1: i32, %arg2: memref<64x128xbf16, #tpu.memory_space<vmem>>, %arg3: memref<128x128xbf16, #tpu.memory_space<vmem>>, %arg4: memref<1x128xf32, #tpu.memory_space<vmem>>, %arg5: memref<64x128xbf16, #tpu.memory_space<vmem>>, %arg6: memref<256x128xbf16, #tpu.memory_space<vmem>>, %arg7: memref<1x128xf32, #tpu.memory_space<vmem>>, %arg8: memref<64x128xf32, #tpu.memory_space<vmem>>, %arg9: memref<64x128xf32, #tpu.memory_space<vmem>>) attributes {dimension_semantics = [#tpu.dimension_semantics<parallel>, #tpu.dimension_semantics<arbitrary>], iteration_bounds = array<i64: 2, 1>, scalar_prefetch = 0 : i64, scratch_operands = 1 : i64, tpu.core_type = #tpu.core_type<tc>, window_params = [{transform_indices = @transform_0, window_bounds = array<i64: 64, 128>}, {pipeline_mode = #tpu.pipeline_mode<synchronous>, transform_indices = @transform_1, window_bounds = array<i64: 128, 128>}, {pipeline_mode = #tpu.pipeline_mode<synchronous>, transform_indices = @transform_2, window_bounds = array<i64: 1, 128>}, {transform_indices = @transform_3, window_bounds = array<i64: 64, 128>}, {pipeline_mode = #tpu.pipeline_mode<synchronous>, transform_indices = @transform_4, window_bounds = array<i64: 256, 128>}, {pipeline_mode = #tpu.pipeline_mode<synchronous>, transform_indices = @transform_5, window_bounds = array<i64: 1, 128>}, {transform_indices = @transform_6, window_bounds = array<i64: 64, 128>}]} {
    %c0_i32 = arith.constant 0 : i32
    %0 = arith.cmpi eq, %arg1, %c0_i32 : i32
    %1 = arith.extui %0 : i1 to i32
    %c0_i32_0 = arith.constant 0 : i32
    %2 = arith.cmpi ne, %1, %c0_i32_0 : i32
    scf.if %2 {
      %cst_10 = arith.constant 0.000000e+00 : f32
      %12 = vector.broadcast %cst_10 : f32 to vector<64x128xf32>
      %c0_11 = arith.constant 0 : index
      %c0_12 = arith.constant 0 : index
      %13 = vector.load %arg9[%c0_11, %c0_12] : memref<64x128xf32, #tpu.memory_space<vmem>>, vector<64x128xf32>
      tpu.vector_store %arg9[%c0_11, %c0_12], %12 {strides = array<i32>} : memref<64x128xf32, #tpu.memory_space<vmem>>, vector<64x128xf32>,
    } else {
    }
    %c0 = arith.constant 0 : index
    %c0_1 = arith.constant 0 : index
    %3 = vector.load %arg3[%c0, %c0_1] : memref<128x128xbf16, #tpu.memory_space<vmem>>, vector<128x128xbf16>
    %c0_2 = arith.constant 0 : index
    %c0_3 = arith.constant 0 : index
    %4 = vector.load %arg9[%c0_2, %c0_3] : memref<64x128xf32, #tpu.memory_space<vmem>>, vector<64x128xf32>
    %c0_4 = arith.constant 0 : index
    %c0_5 = arith.constant 0 : index
    %5 = vector.load %arg2[%c0_4, %c0_5] : memref<64x128xbf16, #tpu.memory_space<vmem>>, vector<64x128xbf16>
    %cst = arith.constant dense<0.000000e+00> : vector<64x128xf32>
    %6 = tpu.matmul %5, %3, %cst {dimension_numbers = #tpu.dot_dimension_numbers<[1], [0], [0], [1], [0, 0, 1, 1], [], []>} : vector<64x128xbf16>, vector<128x128xbf16>, vector<64x128xf32> -> vector<64x128xf32>
    %7 = arith.addf %4, %6 : vector<64x128xf32>
    %c0_6 = arith.constant 0 : index
    %c0_7 = arith.constant 0 : index
    %8 = vector.load %arg9[%c0_6, %c0_7] : memref<64x128xf32, #tpu.memory_space<vmem>>, vector<64x128xf32>
    tpu.vector_store %arg9[%c0_6, %c0_7], %7 {strides = array<i32>} : memref<64x128xf32, #tpu.memory_space<vmem>>, vector<64x128xf32>,
    %c0_i32_8 = arith.constant 0 : i32
    %9 = arith.cmpi eq, %arg1, %c0_i32_8 : i32
    %10 = arith.extui %9 : i1 to i32
    %c0_i32_9 = arith.constant 0 : i32
    %11 = arith.cmpi ne, %10, %c0_i32_9 : i32
    scf.if %11 {
      %c0_10 = arith.constant 0 : index
      %c0_11 = arith.constant 0 : index
      %12 = vector.load %arg9[%c0_10, %c0_11] : memref<64x128xf32, #tpu.memory_space<vmem>>, vector<64x128xf32>
      %c0_12 = arith.constant 0 : index
      %c0_13 = arith.constant 0 : index
      %13 = vector.load %arg4[%c0_12, %c0_13] : memref<1x128xf32, #tpu.memory_space<vmem>>, vector<1x128xf32>
      %14 = vector.broadcast %13 : vector<1x128xf32> to vector<64x128xf32>
      %15 = arith.addf %12, %14 : vector<64x128xf32>
      %cst_14 = arith.constant 0.000000e+00 : f32
      %16 = vector.broadcast %cst_14 : f32 to vector<64x128xf32>
      %17 = arith.maximumf %15, %16 : vector<64x128xf32>
      %18 = arith.truncf %17 : vector<64x128xf32> to vector<64x128xbf16>
      %c128 = arith.constant 128 : index
      %c0_15 = arith.constant 0 : index
      %19 = vector.load %arg6[%c128, %c0_15] : memref<256x128xbf16, #tpu.memory_space<vmem>>, vector<128x128xbf16>
      %cst_16 = arith.constant dense<0.000000e+00> : vector<64x128xf32>
      %20 = tpu.matmul %18, %19, %cst_16 {dimension_numbers = #tpu.dot_dimension_numbers<[1], [0], [0], [1], [0, 0, 1, 1], [], []>} : vector<64x128xbf16>, vector<128x128xbf16>, vector<64x128xf32> -> vector<64x128xf32>
      %c0_17 = arith.constant 0 : index
      %c0_18 = arith.constant 0 : index
      %21 = vector.load %arg5[%c0_17, %c0_18] : memref<64x128xbf16, #tpu.memory_space<vmem>>, vector<64x128xbf16>
      %c0_19 = arith.constant 0 : index
      %c0_20 = arith.constant 0 : index
      %22 = vector.load %arg6[%c0_19, %c0_20] : memref<256x128xbf16, #tpu.memory_space<vmem>>, vector<128x128xbf16>
      %cst_21 = arith.constant dense<0.000000e+00> : vector<64x128xf32>
      %23 = tpu.matmul %21, %22, %cst_21 {dimension_numbers = #tpu.dot_dimension_numbers<[1], [0], [0], [1], [0, 0, 1, 1], [], []>} : vector<64x128xbf16>, vector<128x128xbf16>, vector<64x128xf32> -> vector<64x128xf32>
      %24 = arith.addf %20, %23 : vector<64x128xf32>
      %c0_22 = arith.constant 0 : index
      %c0_23 = arith.constant 0 : index
      %25 = vector.load %arg7[%c0_22, %c0_23] : memref<1x128xf32, #tpu.memory_space<vmem>>, vector<1x128xf32>
      %26 = vector.broadcast %25 : vector<1x128xf32> to vector<64x128xf32>
      %27 = arith.addf %24, %26 : vector<64x128xf32>
      %28 = tpu.iota {dimensions = array<i32: 1>} : vector<64x128xi32>
      %c4_i32 = arith.constant 4 : i32
      %29 = vector.broadcast %c4_i32 : i32 to vector<64x128xi32>
      %30 = arith.cmpi slt, %28, %29 : vector<64x128xi32>
      %cst_24 = arith.constant -1.000000e+30 : f32
      %31 = vector.broadcast %cst_24 : f32 to vector<64x128xf32>
      %32 = arith.select %30, %27, %31 : vector<64x128xi1>, vector<64x128xf32>
      %cst_25 = arith.constant dense<0xFF800000> : vector<64xf32>
      %33 = vector.multi_reduction <maximumf>, %32, %cst_25 [1] : vector<64x128xf32> to vector<64xf32>
      %34 = vector.shape_cast %33 : vector<64xf32> to vector<64x1xf32>
      %35 = vector.broadcast %34 : vector<64x1xf32> to vector<64x128xf32>
      %36 = arith.subf %32, %35 : vector<64x128xf32>
      %37 = math.exp %36 : vector<64x128xf32>
      %cst_26 = arith.constant dense<0.000000e+00> : vector<64xf32>
      %38 = vector.multi_reduction <add>, %37, %cst_26 [1] : vector<64x128xf32> to vector<64xf32>
      %39 = vector.shape_cast %38 : vector<64xf32> to vector<64x1xf32>
      %40 = math.log %39 : vector<64x1xf32>
      %41 = vector.broadcast %40 : vector<64x1xf32> to vector<64x128xf32>
      %42 = arith.subf %36, %41 : vector<64x128xf32>
      %c0_27 = arith.constant 0 : index
      %c0_28 = arith.constant 0 : index
      %43 = vector.load %arg8[%c0_27, %c0_28] : memref<64x128xf32, #tpu.memory_space<vmem>>, vector<64x128xf32>
      tpu.vector_store %arg8[%c0_27, %c0_28], %42 {strides = array<i32>} : memref<64x128xf32, #tpu.memory_space<vmem>>, vector<64x128xf32>,
    } else {
    }
    return
  }
  func.func @transform_0(%arg0: i32, %arg1: i32) -> (i32, i32) {
    %c0_i32 = arith.constant 0 : i32
    return %arg0, %arg1 : i32, i32
  }
  func.func @transform_1(%arg0: i32, %arg1: i32) -> (i32, i32) {
    %c0_i32 = arith.constant 0 : i32
    %c0_i32_0 = arith.constant 0 : i32
    %c0_i32_1 = arith.constant 0 : i32
    return %c0_i32, %c0_i32_0 : i32, i32
  }
  func.func @transform_2(%arg0: i32, %arg1: i32) -> (i32, i32) {
    %c0_i32 = arith.constant 0 : i32
    %c0_i32_0 = arith.constant 0 : i32
    %c0_i32_1 = arith.constant 0 : i32
    return %c0_i32, %c0_i32_0 : i32, i32
  }
  func.func @transform_3(%arg0: i32, %arg1: i32) -> (i32, i32) {
    %c0_i32 = arith.constant 0 : i32
    %c0_i32_0 = arith.constant 0 : i32
    return %arg0, %c0_i32 : i32, i32
  }
  func.func @transform_4(%arg0: i32, %arg1: i32) -> (i32, i32) {
    %c0_i32 = arith.constant 0 : i32
    %c0_i32_0 = arith.constant 0 : i32
    %c0_i32_1 = arith.constant 0 : i32
    return %c0_i32, %c0_i32_0 : i32, i32
  }
  func.func @transform_5(%arg0: i32, %arg1: i32) -> (i32, i32) {
    %c0_i32 = arith.constant 0 : i32
    %c0_i32_0 = arith.constant 0 : i32
    %c0_i32_1 = arith.constant 0 : i32
    return %c0_i32, %c0_i32_0 : i32, i32
  }
  func.func @transform_6(%arg0: i32, %arg1: i32) -> (i32, i32) {
    %c0_i32 = arith.constant 0 : i32
    %c0_i32_0 = arith.constant 0 : i32
    return %arg0, %c0_i32 : i32, i32
  }
}

</mosaic_0001>

<bundles_post_ra>
// kernel: sgc_forward.4
= control target key start
LH: loop header
LB: loop body
LE: loop exit
PB: predicated region body
PF: predicated region fallthrough
CT: control target
= control target key end

     0   :  { %s562_s9 = smov 0   ;;  %s616_s0 = inlined_call_operand.vmem [shape: bf16[128,128], index: 0, kind: input, shape index: {}]   ;;  %s617_s1 = inlined_call_operand.vmem [shape: bf16[128,128], index: 1, kind: input, shape index: {}]   ;;  %s618_s2 = inlined_call_operand.vmem [shape: bf16[128,128], index: 2, kind: output, shape index: {}]  }
   0x1 LB: > { %s405_s10 = sadd.s32 4294967295, %s545_s9   ;;  %p409_p0 = scmp.ge.s32.totalorder %s545_s9, 1  ;;  %s545_s9 = sphi %s562_s9, %s12_s9  }
   0x2   : > { %p113_p1 = scmp.lt.s32.totalorder %s545_s9, 3 }
   0x4   : > { %p114_p2 = pnand %p409_p0, %p113_p1 }
   0x5   : > { %s410_s13 = sshll.u32 (!%p114_p2), %s405_s10, 3 }
   0x6   : > { %117 = sbr.rel (%p114_p2) target bundleno = 246 (0xf6), region = 28  ;;  %p136_p3 = scmp.lt.s32.totalorder (!%p114_p2), %s410_s13, 15 }
   0xb   : > { %v527_v0 = vld [vmem:[%s617_s1 + $0x38] sm:$0xff]   ;;  %v528_v1 = vld [vmem:[%s617_s1 + $0x30] sm:$0xff]   ;;  %s620_s13 = smov (!%p136_p3, %s410_s13), 15  ;;  %v529_v2 = vld [vmem:[%s617_s1 + $0x28] sm:$0xff]  }
   0xc   : > { %479 = vmatprep.subr.bf16.mxu0 %v527_v0  ;;  %503 = vmatprep.subr.bf16.mxu1 %v527_v0  ;;  %s411_s18 = sshll.u32 %s620_s13, 2  ;;  %v530_v3 = vld [vmem:[%s617_s1 + $0x20] sm:$0xff]   ;;  %v531_v6 = vld [vmem:[%s617_s1 + $0x18] sm:$0xff]   ;;  %v532_v7 = vld [vmem:[%s617_s1 + $0x10] sm:$0xff]  }
   0xd   : > { %480 = vmatpush3.bf16.msra.mxu0 %v527_v0  ;;  %511 = vmatpush3.bf16.msra.mxu1 %v527_v0  ;;  %s587_s21 = scalar_lea.vmem %s616_s0, %s411_s18  ;;  %v533_v8 = vld [vmem:[%s617_s1 + $0x8] sm:$0xff]   ;;  %v534_v9 = vld [vmem:[%s617_s1] sm:$0xff]   ;;  %s145_s6 = scalar_lea.vmem %s618_s2, %s411_s18 }
   0xe   : > { %481 = vmatprep.subr.bf16.mxu0 %v528_v1  ;;  %504 = vmatprep.subr.bf16.mxu1 %v528_v1  ;;  %v535_v4 = vld [vmem:[%s587_s21] sm:$0xff]   ;;  %v536_v5 = vld [vmem:[%s587_s21 + $0x10] sm:$0xff]   ;;  %v537_v10 = vld [vmem:[%s587_s21 + $0x8] sm:$0xff]  }
   0xf   : > { %495 = vmatprep.mubr.bf16.mxu0 %v535_v4  ;;  %499 = vmatprep.mubr.bf16.mxu1 %v536_v5  ;;  %v538_v11 = vld [vmem:[%s587_s21 + $0x18] sm:$0xff]  }
  0x11   : > { %482 = vmatpush3.bf16.msra.mxu0 %v528_v1  ;;  %512 = vmatpush3.bf16.msra.mxu1 %v528_v1 }
  0x12   : > { %483 = vmatprep.subr.bf16.mxu0 %v529_v2  ;;  %505 = vmatprep.subr.bf16.mxu1 %v529_v2 }
  0x15   : > { %484 = vmatpush3.bf16.msra.mxu0 %v529_v2  ;;  %513 = vmatpush3.bf16.msra.mxu1 %v529_v2 }
  0x16   : > { %485 = vmatprep.subr.bf16.mxu0 %v530_v3  ;;  %506 = vmatprep.subr.bf16.mxu1 %v530_v3 }
  0x19   : > { %486 = vmatpush3.bf16.msra.mxu0 %v530_v3  ;;  %514 = vmatpush3.bf16.msra.mxu1 %v530_v3 }
  0x1a   : > { %487 = vmatprep.subr.bf16.mxu0 %v531_v6  ;;  %507 = vmatprep.subr.bf16.mxu1 %v531_v6 }
  0x1d   : > { %488 = vmatpush3.bf16.msra.mxu0 %v531_v6  ;;  %515 = vmatpush3.bf16.msra.mxu1 %v531_v6 }
  0x1e   : > { %489 = vmatprep.subr.bf16.mxu0 %v532_v7  ;;  %508 = vmatprep.subr.bf16.mxu1 %v532_v7 }
  0x21   : > { %490 = vmatpush3.bf16.msra.mxu0 %v532_v7  ;;  %516 = vmatpush3.bf16.msra.mxu1 %v532_v7 }
  0x22   : > { %491 = vmatprep.subr.bf16.mxu0 %v533_v8  ;;  %509 = vmatprep.subr.bf16.mxu1 %v533_v8 }
  0x25   : > { %492 = vmatpush3.bf16.msra.mxu0 %v533_v8  ;;  %517 = vmatpush3.bf16.msra.mxu1 %v533_v8 }
  0x26   : > { %493 = vmatprep.subr.bf16.mxu0 %v534_v9  ;;  %510 = vmatprep.subr.bf16.mxu1 %v534_v9 }
  0x29   : > { %494 = vmatpush3.bf16.msra.mxu0 %v534_v9  ;;  %518 = vmatpush3.bf16.msra.mxu1 %v534_v9 }
  0x2c   : > { %496 = vmatmul.mubr.bf16.vlgmr.msra.gmra.mxu0 %v537_v10  ;;  %500 = vmatmul.mubr.bf16.vlgmr.msra.gmra.mxu1 %v538_v11 }
  0xec   : > { %v497_v12 = vpop.f32.mrf.mxu0  ;;  %v501_v13 = vpop.f32.mrf.mxu1 }
  0xee   : > { %v278_v14 = vpop.f32.mrf.mxu0  ;;  %v294_v15 = vpop.f32.mrf.mxu1 }
  0xf0   : > { %v498_v16 = vpop.f32.mrf.mxu0  ;;  %v502_v17 = vpop.f32.mrf.mxu1 }
  0xf1   : > { %v452_v18 = vpack.c.bf16 %v498_v16, %v497_v12  ;;  %v462_v19 = vpack.c.bf16 %v502_v17, %v501_v13 }
  0xf2   : > { %v281_v20 = vpop.f32.mrf.mxu0  ;;  %v297_v21 = vpop.f32.mrf.mxu1 }
  0xf3   : > { %464 = vst [vmem:[%s145_s6 + $0x8] sm:$0xff] %v452_v18   ;;  %466 = vst [vmem:[%s145_s6 + $0x18] sm:$0xff] %v462_v19   ;;  %v447_v22 = vpack.c.bf16 %v281_v20, %v278_v14  ;;  %v457_v23 = vpack.c.bf16 %v297_v21, %v294_v15 }
  0xf5   : > { %448 = vst [vmem:[%s145_s6] sm:$0xff] %v447_v22   ;;  %465 = vst [vmem:[%s145_s6 + $0x10] sm:$0xff] %v457_v23  }
  0xf6 PF: > { %s12_s9 = sadd.s32 1, %s545_s9  }
  0xf7   : > { %p9_p4 = scmp.ge.s32.totalorder %s12_s9, 4  }
  0xf9   :  { %11 = sbr.rel (!%p9_p4) target bundleno = 1 (0x1), region = 58 }

// kernel: sgc_forward.5
= control target key start
LH: loop header
LB: loop body
LE: loop exit
PB: predicated region body
PF: predicated region fallthrough
CT: control target
= control target key end

     0   :  { %s732_s12 = smov 0   ;;  %s734_s13 = smov 0   ;;  %s805_s0 = inlined_call_operand.vmem [shape: bf16[128,128], index: 0, kind: input, shape index: {}]   ;;  %s806_s1 = inlined_call_operand.vmem [shape: bf16[128,128], index: 1, kind: input, shape index: {}]   ;;  %s807_s2 = inlined_call_operand.vmem [shape: f32[1,128], index: 2, kind: input, shape index: {}]   ;;  %s808_s3 = inlined_call_operand.vmem [shape: bf16[128,128], index: 3, kind: output, shape index: {}]  }
   0x1   :  { %s736_s14 = smov 0  }
   0x2 LB: > { %s25_s15 = sadd.s32 1, %s706_s13  ;;  %p541_p0 = scmp.ge.s32.totalorder %s710_s14, 1  ;;  %s710_s14 = sphi %s736_s14, %s13_s14   ;;  %s706_s13 = sphi %s734_s13, %s810_s13   ;;  %s702_s12 = sphi %s732_s12, %s809_s12  }
   0x3   : > { %p27_p1 = scmp.ge.s32.totalorder %s25_s15, 2  ;;  %p155_p2 = scmp.lt.s32.totalorder %s710_s14, 3 }
   0x5   : > { %s812_s15 = smov (%p27_p1, %s25_s15), 0  ;;  %p156_p3 = pnand %p541_p0, %p155_p2 }
   0x6   : > { %s542_s18 = sshll.u32 (!%p156_p3), %s702_s12, 3 }
   0x7   : > { %159 = sbr.rel (%p156_p3) target bundleno = 251 (0xfb), region = 32  ;;  %p183_p4 = scmp.lt.s32.totalorder (!%p156_p3), %s542_s18, 15 }
   0xc   : > { %v676_v0 = vld [vmem:[%s806_s1 + $0x38] sm:$0xff]   ;;  %v677_v1 = vld [vmem:[%s806_s1 + $0x30] sm:$0xff]   ;;  %s814_s18 = smov (!%p183_p4, %s542_s18), 15  ;;  %v678_v2 = vld [vmem:[%s806_s1 + $0x28] sm:$0xff]  }
   0xd   : > { %612 = vmatprep.subr.bf16.mxu0 %v676_v0  ;;  %636 = vmatprep.subr.bf16.mxu1 %v676_v0  ;;  %s543_s23 = sshll.u32 %s814_s18, 2  ;;  %v679_v3 = vld [vmem:[%s806_s1 + $0x20] sm:$0xff]   ;;  %v680_v6 = vld [vmem:[%s806_s1 + $0x18] sm:$0xff]   ;;  %v681_v7 = vld [vmem:[%s806_s1 + $0x10] sm:$0xff]  }
   0xe   : > { %613 = vmatpush3.bf16.msra.mxu0 %v676_v0  ;;  %644 = vmatpush3.bf16.msra.mxu1 %v676_v0  ;;  %s767_s26 = scalar_lea.vmem %s805_s0, %s543_s23  ;;  %v682_v8 = vld [vmem:[%s806_s1 + $0x8] sm:$0xff]   ;;  %v683_v9 = vld [vmem:[%s806_s1] sm:$0xff]   ;;  %s195_s17 = scalar_lea.vmem %s808_s3, %s543_s23 }
   0xf   : > { %614 = vmatprep.subr.bf16.mxu0 %v677_v1  ;;  %637 = vmatprep.subr.bf16.mxu1 %v677_v1  ;;  %v684_v4 = vld [vmem:[%s767_s26] sm:$0xff]   ;;  %v685_v5 = vld [vmem:[%s767_s26 + $0x10] sm:$0xff]   ;;  %v686_v10 = vld [vmem:[%s767_s26 + $0x8] sm:$0xff]  }
  0x10   : > { %628 = vmatprep.mubr.bf16.mxu0 %v684_v4  ;;  %632 = vmatprep.mubr.bf16.mxu1 %v685_v5  ;;  %v687_v11 = vld [vmem:[%s767_s26 + $0x18] sm:$0xff]   ;;  %v558_v12 = vld [vmem:[%s807_s2] ss:$0 sm:$0xff] }
  0x12   : > { %615 = vmatpush3.bf16.msra.mxu0 %v677_v1  ;;  %645 = vmatpush3.bf16.msra.mxu1 %v677_v1 }
  0x13   : > { %616 = vmatprep.subr.bf16.mxu0 %v678_v2  ;;  %638 = vmatprep.subr.bf16.mxu1 %v678_v2 }
  0x16   : > { %617 = vmatpush3.bf16.msra.mxu0 %v678_v2  ;;  %646 = vmatpush3.bf16.msra.mxu1 %v678_v2 }
  0x17   : > { %618 = vmatprep.subr.bf16.mxu0 %v679_v3  ;;  %639 = vmatprep.subr.bf16.mxu1 %v679_v3 }
  0x1a   : > { %619 = vmatpush3.bf16.msra.mxu0 %v679_v3  ;;  %647 = vmatpush3.bf16.msra.mxu1 %v679_v3 }
  0x1b   : > { %620 = vmatprep.subr.bf16.mxu0 %v680_v6  ;;  %640 = vmatprep.subr.bf16.mxu1 %v680_v6 }
  0x1e   : > { %621 = vmatpush3.bf16.msra.mxu0 %v680_v6  ;;  %648 = vmatpush3.bf16.msra.mxu1 %v680_v6 }
  0x1f   : > { %622 = vmatprep.subr.bf16.mxu0 %v681_v7  ;;  %641 = vmatprep.subr.bf16.mxu1 %v681_v7 }
  0x22   : > { %623 = vmatpush3.bf16.msra.mxu0 %v681_v7  ;;  %649 = vmatpush3.bf16.msra.mxu1 %v681_v7 }
  0x23   : > { %624 = vmatprep.subr.bf16.mxu0 %v682_v8  ;;  %642 = vmatprep.subr.bf16.mxu1 %v682_v8 }
  0x26   : > { %625 = vmatpush3.bf16.msra.mxu0 %v682_v8  ;;  %650 = vmatpush3.bf16.msra.mxu1 %v682_v8 }
  0x27   : > { %626 = vmatprep.subr.bf16.mxu0 %v683_v9  ;;  %643 = vmatprep.subr.bf16.mxu1 %v683_v9 }
  0x2a   : > { %627 = vmatpush3.bf16.msra.mxu0 %v683_v9  ;;  %651 = vmatpush3.bf16.msra.mxu1 %v683_v9 }
  0x2d   : > { %629 = vmatmul.mubr.bf16.vlgmr.msra.gmra.mxu0 %v686_v10  ;;  %633 = vmatmul.mubr.bf16.vlgmr.msra.gmra.mxu1 %v687_v11 }
  0xed   : > { %v630_v13 = vpop.f32.mrf.mxu0  ;;  %v634_v14 = vpop.f32.mrf.mxu1 }
  0xee   : > { %v415_v15 = vadd.f32 %v630_v13, %v558_v12  ;;  %v419_v16 = vadd.f32 %v634_v14, %v558_v12 }
  0xef   : > { %v348_v17 = vpop.f32.mrf.mxu0  ;;  %v364_v18 = vpop.f32.mrf.mxu1 }
  0xf0   : > { %v413_v19 = vadd.f32 %v558_v12, %v348_v17  ;;  %v417_v20 = vadd.f32 %v558_v12, %v364_v18  ;;  %v423_v25 = vmax.f32 %v415_v15, 0.0  ;;  %v427_v26 = vmax.f32 %v419_v16, 0.0 }
  0xf1   : > { %v631_v21 = vpop.f32.mrf.mxu0  ;;  %v635_v22 = vpop.f32.mrf.mxu1 }
  0xf2   : > { %v416_v23 = vadd.f32 %v631_v21, %v558_v12  ;;  %v420_v24 = vadd.f32 %v635_v22, %v558_v12  ;;  %v421_v33 = vmax.f32 %v413_v19, 0.0  ;;  %v425_v34 = vmax.f32 %v417_v20, 0.0 }
  0xf3   : > { %v351_v27 = vpop.f32.mrf.mxu0  ;;  %v367_v28 = vpop.f32.mrf.mxu1 }
  0xf4   : > { %v424_v29 = vmax.f32 %v416_v23, 0.0  ;;  %v428_v30 = vmax.f32 %v420_v24, 0.0  ;;  %v414_v31 = vadd.f32 %v558_v12, %v351_v27  ;;  %v418_v32 = vadd.f32 %v558_v12, %v367_v28 }
  0xf6   : > { %v585_v35 = vpack.c.bf16 %v424_v29, %v423_v25  ;;  %v595_v36 = vpack.c.bf16 %v428_v30, %v427_v26  ;;  %v422_v37 = vmax.f32 %v414_v31, 0.0  ;;  %v426_v38 = vmax.f32 %v418_v32, 0.0 }
  0xf8   : > { %597 = vst [vmem:[%s195_s17 + $0x8] sm:$0xff] %v585_v35   ;;  %599 = vst [vmem:[%s195_s17 + $0x18] sm:$0xff] %v595_v36   ;;  %v580_v39 = vpack.c.bf16 %v422_v37, %v421_v33  ;;  %v590_v40 = vpack.c.bf16 %v426_v38, %v425_v34 }
  0xfa   : > { %581 = vst [vmem:[%s195_s17] sm:$0xff] %v580_v39   ;;  %598 = vst [vmem:[%s195_s17 + $0x10] sm:$0xff] %v590_v40  }
  0xfb PF: > { %s13_s14 = sadd.s32 1, %s710_s14   ;;  %s809_s12 = smov %s706_s13 }
  0xfc   : > { %p10_p5 = scmp.ge.s32.totalorder %s13_s14, 4   ;;  %s810_s13 = smov %s812_s15 }
  0xfe   :  { %12 = sbr.rel (!%p10_p5) target bundleno = 2 (0x2), region = 70 }

// kernel: sgc_forward.7
= control target key start
LH: loop header
LB: loop body
LE: loop exit
PB: predicated region body
PF: predicated region fallthrough
CT: control target
= control target key end

     0   :  { %s1338_s21 = smov 0   ;;  %s1340_s22 = smov 0   ;;  %s1518_s0 = inlined_call_operand.vmem [shape: bf16[128,128], index: 0, kind: input, shape index: {}]   ;;  %s1519_s1 = inlined_call_operand.vmem [shape: bf16[128,128], index: 1, kind: input, shape index: {}]   ;;  %s1520_s2 = inlined_call_operand.vmem [shape: f32[1,128], index: 2, kind: input, shape index: {}]   ;;  %s1521_s3 = inlined_call_operand.vmem [shape: bf16[128,128], index: 3, kind: input, shape index: {}]   ;;  %s1522_s4 = inlined_call_operand.vmem [shape: bf16[256,128], index: 4, kind: input, shape index: {}]   ;;  %s1523_s5 = inlined_call_operand.vmem [shape: f32[1,128], index: 5, kind: input, shape index: {}]   ;;  %s1524_s6 = inlined_call_operand.vmem [shape: f32[128,128], index: 6, kind: output, shape index: {}]  }
   0x1   :  { %s1342_s23 = smov 0  }
   0x2 LB: > { %s28_s24 = sadd.s32 1, %s1297_s22  ;;  %p1024_p0 = scmp.ge.s32.totalorder %s1301_s23, 1  ;;  %s1301_s23 = sphi %s1342_s23, %s16_s23   ;;  %s1297_s22 = sphi %s1340_s22, %s1526_s22   ;;  %s1293_s21 = sphi %s1338_s21, %s1525_s21  }
   0x3   : > { %p30_p1 = scmp.ge.s32.totalorder %s28_s24, 2  ;;  %p241_p2 = scmp.lt.s32.totalorder %s1301_s23, 3 }
   0x5   : > { %s1528_s24 = smov (%p30_p1, %s28_s24), 0  ;;  %p242_p3 = pnand %p1024_p0, %p241_p2 }
   0x6   : > { %s1025_s27 = sshll.u32 (!%p242_p3), %s1293_s21, 3 }
   0x7   : > { %245 = sbr.rel (%p242_p3) target bundleno = 780 (0x30c), region = 44  ;;  %p280_p4 = scmp.lt.s32.totalorder (!%p242_p3), %s1025_s27, 15 }
   0xc   : > { %v1215_v0 = vld [vmem:[%s1519_s1 + $0x38] sm:$0xff]   ;;  %v1216_v1 = vld [vmem:[%s1519_s1 + $0x30] sm:$0xff]   ;;  %s1530_s27 = smov (!%p280_p4, %s1025_s27), 15  ;;  %v1217_v2 = vld [vmem:[%s1519_s1 + $0x28] sm:$0xff]  }
   0xd   : > { %1103 = vmatprep.subr.bf16.mxu0 %v1215_v0  ;;  %s1026_s8 = sshll.u32 %s1530_s27, 2  ;;  %v1218_v3 = vld [vmem:[%s1519_s1 + $0x20] sm:$0xff]   ;;  %v1219_v5 = vld [vmem:[%s1519_s1 + $0x18] sm:$0xff]   ;;  %v1228_v7 = vld [vmem:[%s1522_s4 + $0x30] sm:$0xff]   ;;  %s1030_s25 = sshll.u32 %s1530_s27, 3 }
   0xe   : > { %1104 = vmatpush3.bf16.msra.mxu0 %v1215_v0  ;;  %s1371_s11 = scalar_lea.vmem %s1518_s0, %s1026_s8  ;;  %v1227_v6 = vld [vmem:[%s1522_s4 + $0x38] sm:$0xff]   ;;  %v1220_v8 = vld [vmem:[%s1519_s1 + $0x10] sm:$0xff]   ;;  %v1229_v9 = vld [vmem:[%s1522_s4 + $0x28] sm:$0xff]   ;;  %s1395_s30 = scalar_lea.vmem %s1521_s3, %s1026_s8 }
   0xf   : > { %1105 = vmatprep.subr.bf16.mxu0 %v1216_v1  ;;  %v1223_v4 = vld [vmem:[%s1371_s11] sm:$0xff]   ;;  %1127 = vmatprep.subr.bf16.mxu1 %v1227_v6  ;;  %v1221_v10 = vld [vmem:[%s1519_s1 + $0x8] sm:$0xff]   ;;  %v1231_v14 = vld [vmem:[%s1522_s4 + $0x18] sm:$0xff]   ;;  %s1491_s29 = scalar_lea.vmem %s1524_s6, %s1030_s25 }
  0x10   : > { %1119 = vmatprep.mubr.bf16.mxu0 %v1223_v4  ;;  %1128 = vmatpush3.bf16.msra.mxu1 %v1227_v6  ;;  %v1230_v11 = vld [vmem:[%s1522_s4 + $0x20] sm:$0xff]   ;;  %v1232_v15 = vld [vmem:[%s1522_s4 + $0x10] sm:$0xff]   ;;  %v1235_v16 = vld [vmem:[%s1522_s4 + $0x78] sm:$0xff]  }
  0x11   : > { %1129 = vmatprep.subr.bf16.mxu1 %v1228_v7  ;;  %v1236_v12 = vld [vmem:[%s1395_s30] sm:$0xff]   ;;  %v1224_v17 = vld [vmem:[%s1371_s11 + $0x8] sm:$0xff]   ;;  %v1225_v18 = vld [vmem:[%s1371_s11 + $0x10] sm:$0xff]  }
  0x12   : > { %1106 = vmatpush3.bf16.msra.mxu0 %v1216_v1  ;;  %v1222_v13 = vld [vmem:[%s1519_s1] sm:$0xff]   ;;  %1143 = vmatprep.mubr.bf16.mxu1 %v1236_v12  ;;  %v1233_v19 = vld [vmem:[%s1522_s4 + $0x8] sm:$0xff]   ;;  %v1238_v20 = vld [vmem:[%s1522_s4 + $0x70] sm:$0xff]  }
  0x13   : > { %1107 = vmatprep.subr.bf16.mxu0 %v1217_v2  ;;  %v1234_v21 = vld [vmem:[%s1522_s4] sm:$0xff]   ;;  %v1239_v22 = vld [vmem:[%s1522_s4 + $0x68] sm:$0xff]   ;;  %v1226_v23 = vld [vmem:[%s1371_s11 + $0x18] sm:$0xff]  }
  0x14   : > { %1130 = vmatpush3.bf16.msra.mxu1 %v1228_v7  ;;  %v1240_v24 = vld [vmem:[%s1522_s4 + $0x60] sm:$0xff]   ;;  %v1237_v25 = vld [vmem:[%s1395_s30 + $0x8] sm:$0xff]   ;;  %v1241_v26 = vld [vmem:[%s1522_s4 + $0x58] sm:$0xff]  }
  0x15   : > { %1131 = vmatprep.subr.bf16.mxu1 %v1229_v9  ;;  %v1242_v27 = vld [vmem:[%s1522_s4 + $0x50] sm:$0xff]   ;;  %v1243_v28 = vld [vmem:[%s1522_s4 + $0x48] sm:$0xff]   ;;  %v1245_v30 = vld [vmem:[%s1395_s30 + $0x18] sm:$0xff]  }
  0x16   : > { %1108 = vmatpush3.bf16.msra.mxu0 %v1217_v2  ;;  %v1244_v29 = vld [vmem:[%s1395_s30 + $0x10] sm:$0xff]   ;;  %v1246_v31 = vld [vmem:[%s1522_s4 + $0x40] sm:$0xff]   ;;  %v841_v2 = vlaneseq }
  0x17   : > { %1109 = vmatprep.subr.bf16.mxu0 %v1218_v3  ;;  %v1043_v34 = vld [vmem:[%s1520_s2] ss:$0 sm:$0xff] }
  0x18   : > { %1132 = vmatpush3.bf16.msra.mxu1 %v1229_v9  ;;  %v842_v4 = vand.u32 127, %v841_v2  ;;  %v1064_v6 = vld [vmem:[%s1523_s5] ss:$0 sm:$0xff] }
  0x19   : > { %1133 = vmatprep.subr.bf16.mxu1 %v1230_v11 }
  0x1a   : > { %1110 = vmatpush3.bf16.msra.mxu0 %v1218_v3  ;;  %vm843_vm0 = vcmp.lt.s32.totalorder %v842_v4, 4 }
  0x1b   : > { %1111 = vmatprep.subr.bf16.mxu0 %v1219_v5 }
  0x1c   : > { %1134 = vmatpush3.bf16.msra.mxu1 %v1230_v11 }
  0x1d   : > { %1135 = vmatprep.subr.bf16.mxu1 %v1231_v14 }
  0x1e   : > { %1112 = vmatpush3.bf16.msra.mxu0 %v1219_v5 }
  0x1f   : > { %1113 = vmatprep.subr.bf16.mxu0 %v1220_v8 }
  0x20   : > { %1136 = vmatpush3.bf16.msra.mxu1 %v1231_v14 }
  0x21   : > { %1137 = vmatprep.subr.bf16.mxu1 %v1232_v15 }
  0x22   : > { %1114 = vmatpush3.bf16.msra.mxu0 %v1220_v8 }
  0x23   : > { %1115 = vmatprep.subr.bf16.mxu0 %v1221_v10 }
  0x24   : > { %1138 = vmatpush3.bf16.msra.mxu1 %v1232_v15 }
  0x25   : > { %1139 = vmatprep.subr.bf16.mxu1 %v1233_v19 }
  0x26   : > { %1116 = vmatpush3.bf16.msra.mxu0 %v1221_v10 }
  0x27   : > { %1117 = vmatprep.subr.bf16.mxu0 %v1222_v13 }
  0x28   : > { %1140 = vmatpush3.bf16.msra.mxu1 %v1233_v19 }
  0x29   : > { %1141 = vmatprep.subr.bf16.mxu1 %v1234_v21 }
  0x2a   : > { %1118 = vmatpush3.bf16.msra.mxu0 %v1222_v13 }
  0x2b   : > { %1151 = vmatprep.subr.bf16.mxu0 %v1235_v16 }
  0x2c   : > { %1142 = vmatpush3.bf16.msra.mxu1 %v1234_v21 }
  0x2d   : > { %1120 = vmatmul.mubr.bf16.vlgmr.msra.gmra.mxu0 %v1224_v17  ;;  %1175 = vmatprep.subr.bf16.mxu1 %v1235_v16 }
  0x2e   : > { %1123 = vmatprep.mubr.bf16.mxu0 %v1225_v18  ;;  %1152 = vmatpush3.bf16.msra.mxu0 %v1235_v16 }
  0x2f   : > { %1153 = vmatprep.subr.bf16.mxu0 %v1238_v20  ;;  %1144 = vmatmul.mubr.bf16.vlgmr.msra.gmra.mxu1 %v1237_v25 }
  0x30   : > { %1183 = vmatpush3.bf16.msra.mxu1 %v1235_v16  ;;  %1147 = vmatprep.mubr.bf16.mxu1 %v1244_v29 }
  0x31   : > { %1176 = vmatprep.subr.bf16.mxu1 %v1238_v20 }
  0x32   : > { %1154 = vmatpush3.bf16.msra.mxu0 %v1238_v20 }
  0x33   : > { %1155 = vmatprep.subr.bf16.mxu0 %v1239_v22 }
  0x34   : > { %1184 = vmatpush3.bf16.msra.mxu1 %v1238_v20 }
  0x35   : > { %1124 = vmatmul.mubr.bf16.gmra.mxu0 %v1226_v23  ;;  %1177 = vmatprep.subr.bf16.mxu1 %v1239_v22 }
  0x36   : > { %1156 = vmatpush3.bf16.msra.mxu0 %v1239_v22 }
  0x37   : > { %1157 = vmatprep.subr.bf16.mxu0 %v1240_v24  ;;  %1148 = vmatmul.mubr.bf16.gmra.mxu1 %v1245_v30 }
  0x38   : > { %1185 = vmatpush3.bf16.msra.mxu1 %v1239_v22 }
  0x39   : > { %1178 = vmatprep.subr.bf16.mxu1 %v1240_v24 }
  0x3a   : > { %1158 = vmatpush3.bf16.msra.mxu0 %v1240_v24 }
  0x3b   : > { %1159 = vmatprep.subr.bf16.mxu0 %v1241_v26 }
  0x3c   : > { %1186 = vmatpush3.bf16.msra.mxu1 %v1240_v24 }
  0x3d   : > { %1179 = vmatprep.subr.bf16.mxu1 %v1241_v26 }
  0x3e   : > { %1160 = vmatpush3.bf16.msra.mxu0 %v1241_v26 }
  0x3f   : > { %1161 = vmatprep.subr.bf16.mxu0 %v1242_v27 }
  0x40   : > { %1187 = vmatpush3.bf16.msra.mxu1 %v1241_v26 }
  0x41   : > { %1180 = vmatprep.subr.bf16.mxu1 %v1242_v27 }
  0x42   : > { %1162 = vmatpush3.bf16.msra.mxu0 %v1242_v27 }
  0x43   : > { %1163 = vmatprep.subr.bf16.mxu0 %v1243_v28 }
  0x44   : > { %1188 = vmatpush3.bf16.msra.mxu1 %v1242_v27 }
  0x45   : > { %1181 = vmatprep.subr.bf16.mxu1 %v1243_v28 }
  0x46   : > { %1164 = vmatpush3.bf16.msra.mxu0 %v1243_v28 }
  0x47   : > { %1165 = vmatprep.subr.bf16.mxu0 %v1246_v31 }
  0x48   : > { %1189 = vmatpush3.bf16.msra.mxu1 %v1243_v28 }
  0x49   : > { %1182 = vmatprep.subr.bf16.mxu1 %v1246_v31 }
  0x4a   : > { %1166 = vmatpush3.bf16.msra.mxu0 %v1246_v31 }
  0x4c   : > { %1190 = vmatpush3.bf16.msra.mxu1 %v1246_v31 }
  0xed   : > { %v1121_v32 = vpop.f32.mrf.mxu0 }
  0xee   : > { %v518_v38 = vadd.f32 %v1121_v32, %v1043_v34 }
  0xef   : > { %v451_v33 = vpop.f32.mrf.mxu0  ;;  %v1145_v61 = vpop.f32.mrf.mxu1 }
  0xf0   : > { %v516_v36 = vadd.f32 %v1043_v34, %v451_v33  ;;  %v526_v45 = vmax.f32 %v518_v38, 0.0 }
  0xf1   : > { %v1122_v35 = vpop.f32.mrf.mxu0  ;;  %v682_v62 = vpop.f32.mrf.mxu1 }
  0xf2   : > { %v519_v37 = vadd.f32 %v1122_v35, %v1043_v34  ;;  %v524_v43 = vmax.f32 %v516_v36, 0.0 }
  0xf3   : > { %v454_v39 = vpop.f32.mrf.mxu0  ;;  %v1146_v63 = vpop.f32.mrf.mxu1 }
  0xf4   : > { %v517_v40 = vadd.f32 %v1043_v34, %v454_v39  ;;  %v527_v41 = vmax.f32 %v519_v37, 0.0 }
  0xf5   : > { %v1125_v42 = vpop.f32.mrf.mxu0  ;;  %v685_v0 = vpop.f32.mrf.mxu1 }
  0xf6   : > { %v525_v44 = vmax.f32 %v517_v40, 0.0  ;;  %v533_v48 = vpack.c.bf16 %v527_v41, %v526_v45  ;;  %v522_v52 = vadd.f32 %v1125_v42, %v1043_v34 }
  0xf7   : > { %v467_v46 = vpop.f32.mrf.mxu0  ;;  %v1149_v1 = vpop.f32.mrf.mxu1 }
  0xf8   : > { %v532_v47 = vpack.c.bf16 %v525_v44, %v524_v43  ;;  %v520_v50 = vadd.f32 %v1043_v34, %v467_v46  ;;  %v530_v58 = vmax.f32 %v522_v52, 0.0 }
  0xf9   : > { %v1126_v49 = vpop.f32.mrf.mxu0  ;;  %v698_v3 = vpop.f32.mrf.mxu1 }
  0xfa   : > { %v523_v51 = vadd.f32 %v1126_v49, %v1043_v34  ;;  %1167 = vmatprep.mubr.bf16.mxu0 %v532_v47  ;;  %v528_v56 = vmax.f32 %v520_v50, 0.0 }
  0xfb   : > { %v470_v53 = vpop.f32.mrf.mxu0  ;;  %1168 = vmatmul.mubr.bf16.vlgmr.msra.gmra.mxu0 %v533_v48  ;;  %v1150_v8 = vpop.f32.mrf.mxu1 }
  0xfc   : > { %v521_v54 = vadd.f32 %v1043_v34, %v470_v53  ;;  %v531_v55 = vmax.f32 %v523_v51, 0.0 }
  0xfd   : > { %v701_v16 = vpop.f32.mrf.mxu1 }
  0xfe   : > { %v529_v57 = vmax.f32 %v521_v54, 0.0  ;;  %v535_v60 = vpack.c.bf16 %v531_v55, %v530_v58 }
 0x100   : > { %v534_v59 = vpack.c.bf16 %v529_v57, %v528_v56 }
 0x102   : > { %1171 = vmatprep.mubr.bf16.mxu1 %v534_v59 }
 0x103   : > { %1172 = vmatmul.mubr.bf16.vlgmr.msra.gmra.mxu1 %v535_v60 }
 0x1bb   : > { %v1169_v5 = vpop.f32.mrf.mxu0 }
 0x1bc   : > { %v804_v7 = vadd.f32 %v1169_v5, %v1145_v61 }
 0x1bd   : > { %v795_v9 = vpop.f32.mrf.mxu0 }
 0x1be   : > { %v796_v10 = vadd.f32 %v795_v9, %v682_v62  ;;  %v835_v11 = vadd.f32 %v1064_v6, %v804_v7 }
 0x1bf   : > { %v1170_v12 = vpop.f32.mrf.mxu0 }
 0x1c0   : > { %v807_v13 = vadd.f32 %v1170_v12, %v1146_v63  ;;  %v846_v14 = vsel %vm843_vm0, %v835_v11, -1e+30  ;;  %v833_v15 = vadd.f32 %v1064_v6, %v796_v10 }
 0x1c1   : > { %856 = vmax.xlane.f32.xlu1 %v846_v14  ;;  %v798_v17 = vpop.f32.mrf.mxu0 }
 0x1c2   : > { %v799_v18 = vadd.f32 %v798_v17, %v685_v0  ;;  %v844_v19 = vsel %vm843_vm0, %v833_v15, -1e+30  ;;  %v836_v20 = vadd.f32 %v1064_v6, %v807_v13 }
 0x1c3   : > { %852 = vmax.xlane.f32.xlu0 %v844_v19  ;;  %v1173_v21 = vpop.f32.mrf.mxu1 }
 0x1c4   : > { %v847_v22 = vsel %vm843_vm0, %v836_v20, -1e+30  ;;  %v834_v23 = vadd.f32 %v1064_v6, %v799_v18  ;;  %v820_v25 = vadd.f32 %v1173_v21, %v1149_v1 }
 0x1c5   : > { %858 = vmax.xlane.f32.xlu1 %v847_v22  ;;  %v811_v24 = vpop.f32.mrf.mxu1 }
 0x1c6   : > { %v812_v26 = vadd.f32 %v811_v24, %v698_v3  ;;  %v845_v27 = vsel %vm843_vm0, %v834_v23, -1e+30  ;;  %v839_v34 = vadd.f32 %v1064_v6, %v820_v25 }
 0x1c7   : > { %854 = vmax.xlane.f32.xlu0 %v845_v27  ;;  %v1174_v28 = vpop.f32.mrf.mxu1 }
 0x1c8   : > { %v837_v29 = vadd.f32 %v1064_v6, %v812_v26  ;;  %v823_v31 = vadd.f32 %v1174_v28, %v1150_v8  ;;  %v850_v37 = vsel %vm843_vm0, %v839_v34, -1e+30 }
 0x1c9   : > { %v814_v30 = vpop.f32.mrf.mxu1 }
 0x1ca   : > { %v815_v32 = vadd.f32 %v814_v30, %v701_v16  ;;  %v848_v33 = vsel %vm843_vm0, %v837_v29, -1e+30  ;;  %v840_v38 = vadd.f32 %v1064_v6, %v823_v31 }
 0x1cb   : > { %860 = vmax.xlane.f32.xlu0 %v848_v33 }
 0x1cc   : > { %v838_v35 = vadd.f32 %v1064_v6, %v815_v32  ;;  %v851_v39 = vsel %vm843_vm0, %v840_v38, -1e+30 }
 0x1ce   : > { %v849_v36 = vsel %vm843_vm0, %v838_v35, -1e+30 }
 0x1cf   : > { %862 = vmax.xlane.f32.xlu1 %v849_v36  ;;  %864 = vmax.xlane.f32.xlu0 %v850_v37 }
 0x1d3   : > { %866 = vmax.xlane.f32.xlu1 %v851_v39 }
 0x24a   : > { %v857_v40 = vpop.xlane.xlu1 %856 }
 0x24b   : > { %v1463_v41 = vsub.f32 %v846_v14, %v857_v40 }
 0x24c   : > { %v853_v42 = vpop.xlane.xlu0 %852 }
 0x24d   : > { %v880_v43 = vmul.f32 1.442695, %v1463_v41  ;;  %v1466_v44 = vsub.f32 %v844_v19, %v853_v42 }
 0x24e   : > { %v859_v45 = vpop.xlane.xlu1 %858 }
 0x24f   : > { %1247 = vpow2.f32 %v880_v43  ;;  %v876_v46 = vmul.f32 1.442695, %v1466_v44  ;;  %v1469_v47 = vsub.f32 %v847_v22, %v859_v45 }
 0x250   : > { %v855_v48 = vpop.xlane.xlu0 %854 }
 0x251   : > { %v882_v49 = vmul.f32 1.442695, %v1469_v47  ;;  %v1472_v50 = vsub.f32 %v845_v27, %v855_v48  ;;  %1249 = vpow2.f32 %v876_v46 }
 0x253   : > { %1251 = vpow2.f32 %v882_v49  ;;  %v878_v51 = vmul.f32 1.442695, %v1472_v50 }
 0x254   : > { %v861_v52 = vpop.xlane.xlu0 %860 }
 0x255   : > { %v1475_v53 = vsub.f32 %v848_v33, %v861_v52  ;;  %1253 = vpow2.f32 %v878_v51 }
 0x257   : > { %v884_v54 = vmul.f32 1.442695, %v1475_v53 }
 0x258   : > { %v863_v55 = vpop.xlane.xlu1 %862  ;;  %v865_v56 = vpop.xlane.xlu0 %864 }
 0x259   : > { %1255 = vpow2.f32 %v884_v54  ;;  %v1478_v57 = vsub.f32 %v849_v36, %v863_v55  ;;  %v1480_v58 = vsub.f32 %v850_v37, %v865_v56 }
 0x25b   : > { %v886_v59 = vmul.f32 1.442695, %v1478_v57  ;;  %v888_v60 = vmul.f32 1.442695, %v1480_v58 }
 0x25c   : > { %v1248_v61 = vpop.eup %1247  ;;  %v867_v62 = vpop.xlane.xlu1 %866 }
 0x25d   : > { %1257 = vpow2.f32 %v886_v59  ;;  %v1484_v63 = vsub.f32 %v851_v39, %v867_v62  ;;  %896 = vadd.xlane.f32.xlu0 %v1248_v61 }
 0x25e   : > { %1259 = vpow2.f32 %v888_v60  ;;  %v1250_v0 = vpop.eup %1249 }
 0x25f   : > { %v890_v1 = vmul.f32 1.442695, %v1484_v63 }
 0x260   : > { %v1252_v2 = vpop.eup %1251 }
 0x261   : > { %1261 = vpow2.f32 %v890_v1  ;;  %898 = vadd.xlane.f32.xlu1 %v1252_v2  ;;  %892 = vadd.xlane.f32.xlu0 %v1250_v0 }
 0x262   : > { %v1254_v3 = vpop.eup %1253 }
 0x265   : > { %894 = vadd.xlane.f32.xlu1 %v1254_v3 }
 0x266   : > { %v1256_v4 = vpop.eup %1255 }
 0x267   : > { %900 = vadd.xlane.f32.xlu0 %v1256_v4 }
 0x26a   : > { %v1258_v5 = vpop.eup %1257 }
 0x26b   : > { %v1260_v6 = vpop.eup %1259  ;;  %902 = vadd.xlane.f32.xlu1 %v1258_v5 }
 0x26c   : > { %904 = vadd.xlane.f32.xlu0 %v1260_v6 }
 0x26e   : > { %v1262_v7 = vpop.eup %1261 }
 0x26f   : > { %906 = vadd.xlane.f32.xlu1 %v1262_v7 }
 0x2e6   : > { %v897_v8 = vpop.xlane.xlu0 %896 }
 0x2e7   : > { %1263 = vlog2.f32 %v897_v8 }
 0x2ea   : > { %v899_v9 = vpop.xlane.xlu1 %898  ;;  %v893_v10 = vpop.xlane.xlu0 %892 }
 0x2eb   : > { %1265 = vlog2.f32 %v899_v9 }
 0x2ec   : > { %1267 = vlog2.f32 %v893_v10 }
 0x2ee   : > { %v895_v11 = vpop.xlane.xlu1 %894 }
 0x2ef   : > { %1269 = vlog2.f32 %v895_v11 }
 0x2f0   : > { %v901_v12 = vpop.xlane.xlu0 %900 }
 0x2f1   : > { %1271 = vlog2.f32 %v901_v12 }
 0x2f4   : > { %v1264_v13 = vpop.eup %1263  ;;  %v903_v14 = vpop.xlane.xlu1 %902 }
 0x2f5   : > { %v913_v15 = vmul.f32 0.6931472, %v1264_v13  ;;  %1273 = vlog2.f32 %v903_v14  ;;  %v905_v16 = vpop.xlane.xlu0 %904 }
 0x2f6   : > { %1275 = vlog2.f32 %v905_v16 }
 0x2f7   : > { %v926_v17 = vsub.f32 %v1463_v41, %v913_v15 }
 0x2f8   : > { %v1266_v18 = vpop.eup %1265  ;;  %v907_v19 = vpop.xlane.xlu1 %906 }
 0x2f9   : > { %v1268_v20 = vpop.eup %1267  ;;  %934 = vst [vmem:[%s1491_s29 + $0x10] sm:$0xff] %v926_v17  ;;  %v915_v21 = vmul.f32 0.6931472, %v1266_v18  ;;  %1277 = vlog2.f32 %v907_v19 }
 0x2fa   : > { %v909_v22 = vmul.f32 0.6931472, %v1268_v20 }
 0x2fb   : > { %v927_v23 = vsub.f32 %v1469_v47, %v915_v21 }
 0x2fc   : > { %v1270_v24 = vpop.eup %1269  ;;  %v924_v25 = vsub.f32 %v1466_v44, %v909_v22 }
 0x2fd   : > { %935 = vst [vmem:[%s1491_s29 + $0x18] sm:$0xff] %v927_v23  ;;  %v911_v26 = vmul.f32 0.6931472, %v1270_v24 }
 0x2fe   : > { %v1272_v27 = vpop.eup %1271  ;;  %932 = vst [vmem:[%s1491_s29] sm:$0xff] %v924_v25 }
 0x2ff   : > { %v925_v28 = vsub.f32 %v1472_v50, %v911_v26  ;;  %v917_v29 = vmul.f32 0.6931472, %v1272_v27 }
 0x301   : > { %933 = vst [vmem:[%s1491_s29 + $0x8] sm:$0xff] %v925_v28  ;;  %v928_v30 = vsub.f32 %v1475_v53, %v917_v29 }
 0x302   : > { %v1274_v31 = vpop.eup %1273 }
 0x303   : > { %v1276_v32 = vpop.eup %1275  ;;  %936 = vst [vmem:[%s1491_s29 + $0x20] sm:$0xff] %v928_v30  ;;  %v919_v33 = vmul.f32 0.6931472, %v1274_v31 }
 0x304   : > { %v921_v34 = vmul.f32 0.6931472, %v1276_v32 }
 0x305   : > { %v929_v35 = vsub.f32 %v1478_v57, %v919_v33 }
 0x306   : > { %v1278_v36 = vpop.eup %1277  ;;  %v930_v37 = vsub.f32 %v1480_v58, %v921_v34 }
 0x307   : > { %937 = vst [vmem:[%s1491_s29 + $0x28] sm:$0xff] %v929_v35  ;;  %v923_v38 = vmul.f32 0.6931472, %v1278_v36 }
 0x308   : > { %938 = vst [vmem:[%s1491_s29 + $0x30] sm:$0xff] %v930_v37 }
 0x309   : > { %v931_v39 = vsub.f32 %v1484_v63, %v923_v38 }
 0x30b   : > { %939 = vst [vmem:[%s1491_s29 + $0x38] sm:$0xff] %v931_v39 }
 0x30c PF: > { %s16_s23 = sadd.s32 1, %s1301_s23   ;;  %s1525_s21 = smov %s1297_s22 }
 0x30d   : > { %p13_p5 = scmp.ge.s32.totalorder %s16_s23, 4   ;;  %s1526_s22 = smov %s1528_s24 }
 0x30f   :  { %15 = sbr.rel (!%p13_p5) target bundleno = 2 (0x2), region = 85 }

</bundles_post_ra>
